<compile_context>
chip_gen: v6e
topology: v6e:2x2x1
jax: 0.10.0
libtpu: 0.0.40
codegen_flags: <defaults>
</compile_context>

<pallas_src>
import functools

import jax
import jax.numpy as jnp
from jax.experimental import pallas as pl
from jax.experimental.pallas import tpu as pltpu

# Original layer widths / Tanh placement (encoder then decoder).
DIMS = [122, 64, 32, 16, 32, 64, 122]
TANH_AFTER = [True, True, False, True, True, False]

# After fusing the purely linear 32->16->32 bottleneck into one 32->32 layer.
FUSED_TANH_AFTER = (True, True, True, True, False)
N_FUSED = len(FUSED_TANH_AFTER)

F_PAD = 128          # lane-padded feature width (all matmuls lane-dense)
MIN_TB = 16          # sublane alignment for bf16 batch tiles
TB_MAX = 2048        # per-step batch tile cap (~0.5 MiB bf16 per buffer)
BIAS_ROWS = 8        # bias table padded to a full (8,128) tile


def _round_up(x, m):
    return (x + m - 1) // m * m


def _cdiv(a, b):
    return (a + b - 1) // b


def mlp_kernel(x_ref, w_ref, b_ref, o_ref, *, ep_dtype):
    """One (TB,128) batch tile through all five (fused) layers.

    x_ref: (TB,128) bf16 tile; w_ref: (5,128,128) bf16, VMEM-resident;
    b_ref: (8,128) ep_dtype, VMEM-resident; o_ref: (TB,128) bf16.
    Zero padding is inert (padded weight rows/cols and bias lanes are 0 and
    tanh(0)=0), so padded lanes stay exactly 0 end-to-end.
    """
    h = x_ref[...]                                             # bf16
    for i, do_tanh in enumerate(FUSED_TANH_AFTER):
        acc = jnp.dot(h, w_ref[i], preferred_element_type=jnp.float32)
        y = acc.astype(ep_dtype) + b_ref[i]                    # bias add
        h = jnp.tanh(y) if do_tanh else y
        if i + 1 < N_FUSED:
            h = h.astype(jnp.bfloat16)                         # MXU input dtype
    o_ref[...] = h.astype(o_ref.dtype)


def _default_epilogue_dtype():
    # v5e has no bf16 VPU/EUP path -> keep the bias+tanh epilogue in f32 there.
    try:
        kind = jax.devices()[0].device_kind.lower()
    except Exception:
        kind = ""
    return jnp.float32 if "v5" in kind else jnp.bfloat16


def _fuse_and_pad_params(params, ep_dtype):
    """Fuse layers 2&3, then zero-pad to (5,128,128) bf16 W and (8,128) biases."""
    (w0, b0), (w1, b1), (w2, b2), (w3, b3), (w4, b4), (w5, b5) = params
    w23 = w2 @ w3                 # (32,32); exact fusion (no Tanh in between)
    b23 = b2 @ w3 + b3            # (1,32)
    fused = [(w0, b0), (w1, b1), (w23, b23), (w4, b4), (w5, b5)]

    w_all = jnp.zeros((N_FUSED, F_PAD, F_PAD), jnp.float32)
    b_all = jnp.zeros((BIAS_ROWS, F_PAD), jnp.float32)
    for i, (w, b) in enumerate(fused):
        w_all = w_all.at[i, : w.shape[0], : w.shape[1]].set(w)
        b_all = b_all.at[i, : b.shape[1]].set(b[0])
    return w_all.astype(jnp.bfloat16), b_all.astype(ep_dtype)


def _pick_tiles(B, tb=None):
    if tb is None:
        n_steps = _cdiv(B, TB_MAX)
        if B >= 512:              # keep >=2 grid steps so both v7x TCs get work
            n_steps = max(n_steps, 2)
        tb = _round_up(_cdiv(B, n_steps), MIN_TB)
    else:
        tb = _round_up(tb, MIN_TB)
    b_pad = _round_up(max(B, tb), tb)
    return tb, b_pad


def mlp_generator_forward(x, params, *, tb=None, ep_dtype=None):
    """x: [B, 122]. params: list of six (W[in,out], b[1,out]) f32 pairs."""
    B, F = x.shape
    assert F == DIMS[0], F
    if ep_dtype is None:
        ep_dtype = _default_epilogue_dtype()

    tb, b_pad = _pick_tiles(B, tb)

    # bf16 input stream: numerically identical to casting inside the kernel
    # (the first op was h.astype(bf16) anyway) but halves the HBM bytes on the
    # dominant batch traffic.
    x_pad = jnp.zeros((b_pad, F_PAD), jnp.bfloat16)
    x_pad = x_pad.at[:B, :F].set(x.astype(jnp.bfloat16))
    w_all, b_all = _fuse_and_pad_params(params, ep_dtype)

    n_tanh = sum(FUSED_TANH_AFTER)
    cost = pl.CostEstimate(
        flops=2 * b_pad * N_FUSED * F_PAD * F_PAD,
        transcendentals=b_pad * F_PAD * n_tanh,
        bytes_accessed=(2 * b_pad * F_PAD * 2                  # bf16 x in + out
                        + N_FUSED * F_PAD * F_PAD * 2          # bf16 weights
                        + BIAS_ROWS * F_PAD * jnp.dtype(ep_dtype).itemsize),
    )

    out_pad = pl.pallas_call(
        functools.partial(mlp_kernel, ep_dtype=ep_dtype),
        out_shape=jax.ShapeDtypeStruct((b_pad, F_PAD), jnp.bfloat16),
        grid=(b_pad // tb,),
        in_specs=[
            pl.BlockSpec((tb, F_PAD), lambda i: (i, 0)),                 # x tile
            pl.BlockSpec((N_FUSED, F_PAD, F_PAD), lambda i: (0, 0, 0)),  # weights
            pl.BlockSpec((BIAS_ROWS, F_PAD), lambda i: (0, 0)),          # biases
        ],
        out_specs=pl.BlockSpec((tb, F_PAD), lambda i: (i, 0)),
        compiler_params=pltpu.CompilerParams(
            dimension_semantics=("parallel",)),
        cost_estimate=cost,
    )(x_pad, w_all, b_all)

    # Slice the real rows/columns back out and restore the caller's dtype.
    return out_pad[:B, : DIMS[-1]].astype(x.dtype)


def init_params(key):
    """Deterministic init mimicking nn.Linear's uniform(-1/sqrt(in), 1/sqrt(in))."""
    params = []
    for i in range(len(DIMS) - 1):
        fan_in, fan_out = DIMS[i], DIMS[i + 1]
        key, kw, kb = jax.random.split(key, 3)
        bound = 1.0 / jnp.sqrt(jnp.float32(fan_in))
        w = jax.random.uniform(kw, (fan_in, fan_out), jnp.float32, -bound, bound)
        b = jax.random.uniform(kb, (1, fan_out), jnp.float32, -bound, bound)
        params.append((w, b))
    return params


def reference_forward(x, params):
    """Pure-JAX f32 reference matching the PyTorch module exactly (unfused)."""
    h = x
    for i, (w, b) in enumerate(params):
        h = h @ w + b
        if TANH_AFTER[i]:
            h = jnp.tanh(h)
    return h


if __name__ == "__main__":
    key = jax.random.PRNGKey(0)
    kx, kp = jax.random.split(key)
    B = 8
    x = jax.random.normal(kx, (B, 122), jnp.float32)
    params = init_params(kp)

    out = jax.block_until_ready(mlp_generator_forward(x, params))
    ref = reference_forward(x, params)

    assert out.shape == (B, 122), out.shape
    assert out.dtype == jnp.float32, out.dtype
    err = float(jnp.max(jnp.abs(out - ref)))
    # bf16 MXU inputs + bf16 HBM I/O (f32 accumulation) => loose tolerance
    # versus the pure-f32 reference.
    assert jnp.allclose(out, ref, atol=5e-2, rtol=5e-2), err
    print("KERNEL_OK")
</pallas_src>

<mosaic_0001>
module attributes {stable_mosaic.version = 11 : i64} {
  func.func @mlp_kernel(%arg0: i32, %arg1: memref<16x128xbf16, #tpu.memory_space<vmem>>, %arg2: memref<5x128x128xbf16, #tpu.memory_space<vmem>>, %arg3: memref<8x128xbf16, #tpu.memory_space<vmem>>, %arg4: memref<16x128xbf16, #tpu.memory_space<vmem>>) attributes {dimension_semantics = [#tpu.dimension_semantics<parallel>], iteration_bounds = array<i64: 1>, scalar_prefetch = 0 : i64, scratch_operands = 0 : i64, tpu.core_type = #tpu.core_type<tc>, window_params = [{transform_indices = @transform_0, window_bounds = array<i64: 16, 128>}, {pipeline_mode = #tpu.pipeline_mode<synchronous>, transform_indices = @transform_1, window_bounds = array<i64: 5, 128, 128>}, {pipeline_mode = #tpu.pipeline_mode<synchronous>, transform_indices = @transform_2, window_bounds = array<i64: 8, 128>}, {transform_indices = @transform_3, window_bounds = array<i64: 16, 128>}]} {
    %c0 = arith.constant 0 : index
    %c0_0 = arith.constant 0 : index
    %0 = vector.load %arg1[%c0, %c0_0] : memref<16x128xbf16, #tpu.memory_space<vmem>>, vector<16x128xbf16>
    %c0_1 = arith.constant 0 : index
    %c0_2 = arith.constant 0 : index
    %c0_3 = arith.constant 0 : index
    %1 = vector.load %arg2[%c0_1, %c0_2, %c0_3] : memref<5x128x128xbf16, #tpu.memory_space<vmem>>, vector<1x128x128xbf16>
    %2 = vector.shape_cast %1 : vector<1x128x128xbf16> to vector<128x128xbf16>
    %cst = arith.constant dense<0.000000e+00> : vector<16x128xf32>
    %3 = tpu.matmul %0, %2, %cst {dimension_numbers = #tpu.dot_dimension_numbers<[1], [0], [0], [1], [0, 0, 1, 1], [], []>} : vector<16x128xbf16>, vector<128x128xbf16>, vector<16x128xf32> -> vector<16x128xf32>
    %4 = arith.truncf %3 : vector<16x128xf32> to vector<16x128xbf16>
    %c0_4 = arith.constant 0 : index
    %c0_5 = arith.constant 0 : index
    %5 = vector.load %arg3[%c0_4, %c0_5] : memref<8x128xbf16, #tpu.memory_space<vmem>>, vector<1x128xbf16>
    %6 = vector.shape_cast %5 : vector<1x128xbf16> to vector<128xbf16>
    %7 = vector.shape_cast %6 : vector<128xbf16> to vector<1x128xbf16>
    %8 = vector.broadcast %7 : vector<1x128xbf16> to vector<16x128xbf16>
    %9 = arith.addf %4, %8 : vector<16x128xbf16>
    %10 = math.tanh %9 : vector<16x128xbf16>
    %c1 = arith.constant 1 : index
    %c0_6 = arith.constant 0 : index
    %c0_7 = arith.constant 0 : index
    %11 = vector.load %arg2[%c1, %c0_6, %c0_7] : memref<5x128x128xbf16, #tpu.memory_space<vmem>>, vector<1x128x128xbf16>
    %12 = vector.shape_cast %11 : vector<1x128x128xbf16> to vector<128x128xbf16>
    %cst_8 = arith.constant dense<0.000000e+00> : vector<16x128xf32>
    %13 = tpu.matmul %10, %12, %cst_8 {dimension_numbers = #tpu.dot_dimension_numbers<[1], [0], [0], [1], [0, 0, 1, 1], [], []>} : vector<16x128xbf16>, vector<128x128xbf16>, vector<16x128xf32> -> vector<16x128xf32>
    %14 = arith.truncf %13 : vector<16x128xf32> to vector<16x128xbf16>
    %c1_9 = arith.constant 1 : index
    %c0_10 = arith.constant 0 : index
    %15 = vector.load %arg3[%c1_9, %c0_10] : memref<8x128xbf16, #tpu.memory_space<vmem>>, vector<1x128xbf16>
    %16 = vector.shape_cast %15 : vector<1x128xbf16> to vector<128xbf16>
    %17 = vector.shape_cast %16 : vector<128xbf16> to vector<1x128xbf16>
    %18 = vector.broadcast %17 : vector<1x128xbf16> to vector<16x128xbf16>
    %19 = arith.addf %14, %18 : vector<16x128xbf16>
    %20 = math.tanh %19 : vector<16x128xbf16>
    %c2 = arith.constant 2 : index
    %c0_11 = arith.constant 0 : index
    %c0_12 = arith.constant 0 : index
    %21 = vector.load %arg2[%c2, %c0_11, %c0_12] : memref<5x128x128xbf16, #tpu.memory_space<vmem>>, vector<1x128x128xbf16>
    %22 = vector.shape_cast %21 : vector<1x128x128xbf16> to vector<128x128xbf16>
    %cst_13 = arith.constant dense<0.000000e+00> : vector<16x128xf32>
    %23 = tpu.matmul %20, %22, %cst_13 {dimension_numbers = #tpu.dot_dimension_numbers<[1], [0], [0], [1], [0, 0, 1, 1], [], []>} : vector<16x128xbf16>, vector<128x128xbf16>, vector<16x128xf32> -> vector<16x128xf32>
    %24 = arith.truncf %23 : vector<16x128xf32> to vector<16x128xbf16>
    %c2_14 = arith.constant 2 : index
    %c0_15 = arith.constant 0 : index
    %25 = vector.load %arg3[%c2_14, %c0_15] : memref<8x128xbf16, #tpu.memory_space<vmem>>, vector<1x128xbf16>
    %26 = vector.shape_cast %25 : vector<1x128xbf16> to vector<128xbf16>
    %27 = vector.shape_cast %26 : vector<128xbf16> to vector<1x128xbf16>
    %28 = vector.broadcast %27 : vector<1x128xbf16> to vector<16x128xbf16>
    %29 = arith.addf %24, %28 : vector<16x128xbf16>
    %30 = math.tanh %29 : vector<16x128xbf16>
    %c3 = arith.constant 3 : index
    %c0_16 = arith.constant 0 : index
    %c0_17 = arith.constant 0 : index
    %31 = vector.load %arg2[%c3, %c0_16, %c0_17] : memref<5x128x128xbf16, #tpu.memory_space<vmem>>, vector<1x128x128xbf16>
    %32 = vector.shape_cast %31 : vector<1x128x128xbf16> to vector<128x128xbf16>
    %cst_18 = arith.constant dense<0.000000e+00> : vector<16x128xf32>
    %33 = tpu.matmul %30, %32, %cst_18 {dimension_numbers = #tpu.dot_dimension_numbers<[1], [0], [0], [1], [0, 0, 1, 1], [], []>} : vector<16x128xbf16>, vector<128x128xbf16>, vector<16x128xf32> -> vector<16x128xf32>
    %34 = arith.truncf %33 : vector<16x128xf32> to vector<16x128xbf16>
    %c3_19 = arith.constant 3 : index
    %c0_20 = arith.constant 0 : index
    %35 = vector.load %arg3[%c3_19, %c0_20] : memref<8x128xbf16, #tpu.memory_space<vmem>>, vector<1x128xbf16>
    %36 = vector.shape_cast %35 : vector<1x128xbf16> to vector<128xbf16>
    %37 = vector.shape_cast %36 : vector<128xbf16> to vector<1x128xbf16>
    %38 = vector.broadcast %37 : vector<1x128xbf16> to vector<16x128xbf16>
    %39 = arith.addf %34, %38 : vector<16x128xbf16>
    %40 = math.tanh %39 : vector<16x128xbf16>
    %c4 = arith.constant 4 : index
    %c0_21 = arith.constant 0 : index
    %c0_22 = arith.constant 0 : index
    %41 = vector.load %arg2[%c4, %c0_21, %c0_22] : memref<5x128x128xbf16, #tpu.memory_space<vmem>>, vector<1x128x128xbf16>
    %42 = vector.shape_cast %41 : vector<1x128x128xbf16> to vector<128x128xbf16>
    %cst_23 = arith.constant dense<0.000000e+00> : vector<16x128xf32>
    %43 = tpu.matmul %40, %42, %cst_23 {dimension_numbers = #tpu.dot_dimension_numbers<[1], [0], [0], [1], [0, 0, 1, 1], [], []>} : vector<16x128xbf16>, vector<128x128xbf16>, vector<16x128xf32> -> vector<16x128xf32>
    %44 = arith.truncf %43 : vector<16x128xf32> to vector<16x128xbf16>
    %c4_24 = arith.constant 4 : index
    %c0_25 = arith.constant 0 : index
    %45 = vector.load %arg3[%c4_24, %c0_25] : memref<8x128xbf16, #tpu.memory_space<vmem>>, vector<1x128xbf16>
    %46 = vector.shape_cast %45 : vector<1x128xbf16> to vector<128xbf16>
    %47 = vector.shape_cast %46 : vector<128xbf16> to vector<1x128xbf16>
    %48 = vector.broadcast %47 : vector<1x128xbf16> to vector<16x128xbf16>
    %49 = arith.addf %44, %48 : vector<16x128xbf16>
    %c0_26 = arith.constant 0 : index
    %c0_27 = arith.constant 0 : index
    %50 = vector.load %arg4[%c0_26, %c0_27] : memref<16x128xbf16, #tpu.memory_space<vmem>>, vector<16x128xbf16>
    tpu.vector_store %arg4[%c0_26, %c0_27], %49 {strides = array<i32>} : memref<16x128xbf16, #tpu.memory_space<vmem>>, vector<16x128xbf16>,
    return
  }
  func.func @transform_0(%arg0: i32) -> (i32, i32) {
    %c0_i32 = arith.constant 0 : i32
    %c0_i32_0 = arith.constant 0 : i32
    return %arg0, %c0_i32 : i32, i32
  }
  func.func @transform_1(%arg0: i32) -> (i32, i32, i32) {
    %c0_i32 = arith.constant 0 : i32
    %c0_i32_0 = arith.constant 0 : i32
    %c0_i32_1 = arith.constant 0 : i32
    %c0_i32_2 = arith.constant 0 : i32
    return %c0_i32, %c0_i32_0, %c0_i32_1 : i32, i32, i32
  }
  func.func @transform_2(%arg0: i32) -> (i32, i32) {
    %c0_i32 = arith.constant 0 : i32
    %c0_i32_0 = arith.constant 0 : i32
    %c0_i32_1 = arith.constant 0 : i32
    return %c0_i32, %c0_i32_0 : i32, i32
  }
  func.func @transform_3(%arg0: i32) -> (i32, i32) {
    %c0_i32 = arith.constant 0 : i32
    %c0_i32_0 = arith.constant 0 : i32
    return %arg0, %c0_i32 : i32, i32
  }
}

</mosaic_0001>

<bundles_post_ra>
// kernel: tpu_custom_call.1
= control target key start
LH: loop header
LB: loop body
LE: loop exit
PB: predicated region body
PF: predicated region fallthrough
CT: control target
= control target key end

     0   :  { %8 = vsyncpa [#allocation3], 0  ;;  %s1106_s0 = inlined_call_operand.hbm [shape: bf16[16,128], index: 0, kind: input, shape index: {}]   ;;  %s1107_s1 = inlined_call_operand.hbm [shape: bf16[5,128,128], index: 1, kind: input, shape index: {}]   ;;  %s1108_s2 = inlined_call_operand.hbm [shape: bf16[8,128], index: 2, kind: input, shape index: {}]   ;;  %s1109_s3 = inlined_call_operand.hbm [shape: bf16[16,128], index: 3, kind: output, shape index: {}]  }
   0x1   :  { %9 = vsyncpa [#allocation6], 0 }
   0x2   :  { %10 = vsyncpa [#allocation4], 0  ;;  %s1002_s12 = smov [#allocation5]   ;;  %s1003_s14 = smov [#allocation2]  }
   0x3   :  { %s28_s13 = sshll.u32 %s1002_s12, 4  ;;  %s16_s15 = sshll.u32 %s1003_s14, 4  ;;  %s29_s13 = int_to_ptr.vmem [resolvable:$true] %s28_s13  ;;  %s17_s15 = int_to_ptr.vmem [resolvable:$true] %s16_s15 }
   0x4   :  { %s924_s16 = scalar_lea.vmem %s29_s13, 5120  ;;  %p929_p1 = scmp.lt.s32.totalorder %s29_s13, %s29_s13 }
   0x5   :  { %p925_p0 = scmp.ne.s32.totalorder %s29_s13, %s924_s16  ;;  %p930_p2 = scmp.lt.s32.totalorder %s924_s16, %s924_s16 }
   0x7   :  { %p931_p3 = por %p930_p2, %p929_p1 }
   0x9   :  { %p932_p4 = pnand %p931_p3, %p925_p0 }
   0xb   :  { %935 = shalt.err (!%p932_p4)
}
   0xc   :  { %s1004_s17 = smov 64   ;;  %s1005_s18 = smov 4  }
   0xd   :  { %34 = dma.hbm_to_vmem [thread:$0]  %s1107_s1, 5120, %s29_s13, [#allocation6], %s1004_s17, %s1004_s17, %s1005_s18  }
   0xe   :  { %s944_s21 = scalar_lea.vmem %s17_s15, 128  ;;  %p949_p6 = scmp.lt.s32.totalorder %s17_s15, %s17_s15 }
   0xf   :  { %p945_p5 = scmp.ne.s32.totalorder %s17_s15, %s944_s21  ;;  %p950_p7 = scmp.lt.s32.totalorder %s944_s21, %s944_s21 }
  0x11   :  { %p951_p8 = por %p950_p7, %p949_p6 }
  0x13   :  { %p952_p9 = pnand %p951_p8, %p945_p5 }
  0x15   :  { %955 = shalt.err (!%p952_p9)
}
  0x16   :  { %22 = dma.hbm_to_vmem [thread:$0]  %s1106_s0, 128, %s17_s15, [#allocation3], %s1004_s17, %s1004_s17, %s1005_s18  }
  0x17   :  { %s1006_s24 = smov [#allocation7]  }
  0x18   :  { %s41_s25 = sshll.u32 %s1006_s24, 4  ;;  %s42_s25 = int_to_ptr.vmem [resolvable:$true] %s41_s25 }
  0x19   :  { %s964_s26 = scalar_lea.vmem %s42_s25, 64  ;;  %p969_p11 = scmp.lt.s32.totalorder %s42_s25, %s42_s25 }
  0x1a   :  { %p965_p10 = scmp.ne.s32.totalorder %s42_s25, %s964_s26  ;;  %p970_p12 = scmp.lt.s32.totalorder %s964_s26, %s964_s26 }
  0x1c   :  { %p971_p13 = por %p970_p12, %p969_p11 }
  0x1e   :  { %p972_p0 = pnand %p971_p13, %p965_p10 }
  0x20   :  { %975 = shalt.err (!%p972_p0)
}
  0x21   :  { %44 = dma.hbm_to_vmem [thread:$0]  %s1108_s2, 64, %s42_s25, [#allocation6]  }
  0x22   :  { %996 = dma.done.wait [#allocation3], 128  }
  0x23   :  { %997 = vsyncadd [#allocation3], 4294967168 }
  0x24   :  { %998 = dma.done.wait [#allocation6], 5184  }
  0x25   :  { %999 = vsyncadd [#allocation6], 4294962112  ;;  %v1007_v0 = vmov 0.0   ;;  %vm1008_vm0 = vmmov 0   ;;  %v867_v1 = vld [vmem:[#allocation5 + $0x38] sm:$0xff]   ;;  %v868_v2 = vld [vmem:[#allocation5 + $0x30] sm:$0xff]   ;;  %v173_v20 = vlaneseq }
  0x26   :  { %759 = vmatprep.subr.bf16.mxu0 %v1007_v0  ;;  %775 = vmatprep.mubr.msk.bf16.mxu0 %vm1008_vm0, %v1007_v0  ;;  %v869_v3 = vld [vmem:[#allocation5 + $0x28] sm:$0xff]   ;;  %v870_v4 = vld [vmem:[#allocation5 + $0x20] sm:$0xff]   ;;  %v876_v5 = vld [vmem:[#allocation5 + $0x78] sm:$0xff]   ;;  %s1009_s0 = smov [#allocation8]  }
  0x27   :  { %779 = vmatprep.subr.bf16.mxu1 %v1007_v0  ;;  %795 = vmatprep.mubr.msk.bf16.mxu1 %vm1008_vm0, %v1007_v0  ;;  %v877_v6 = vld [vmem:[#allocation5 + $0x70] sm:$0xff]   ;;  %v871_v7 = vld [vmem:[#allocation5 + $0x18] sm:$0xff]   ;;  %v873_v9 = vld [vmem:[#allocation5 + $0x8] sm:$0xff]   ;;  %v1071_v21 = vshrl.u32 %v173_v20, 7  ;;  %s658_s2 = sshll.u32 %s1009_s0, 4  ;;  %s659_s2 = int_to_ptr.vmem [resolvable:$true] %s658_s2 }
  0x28   :  { %760 = vmatpush3.bf16.msra.mxu0 %v867_v1  ;;  %780 = vmatpush3.bf16.msra.mxu1 %v876_v5  ;;  %v872_v8 = vld [vmem:[#allocation5 + $0x10] sm:$0xff]   ;;  %v874_v10 = vld [vmem:[#allocation5] sm:$0xff]   ;;  %v875_v11 = vld [vmem:[#allocation2] sm:$0xff]   ;;  %s976_s28 = scalar_lea.vmem %s659_s2, 128  ;;  %p981_p2 = scmp.lt.s32.totalorder %s659_s2, %s659_s2 }
  0x29   :  { %761 = vmatprep.subr.bf16.mxu0 %v1007_v0  ;;  %781 = vmatprep.subr.bf16.mxu1 %v1007_v0  ;;  %v878_v12 = vld [vmem:[#allocation5 + $0x68] sm:$0xff]   ;;  %v879_v13 = vld [vmem:[#allocation5 + $0x60] sm:$0xff]   ;;  %v880_v14 = vld [vmem:[#allocation5 + $0x58] sm:$0xff]   ;;  %v175_v24 = vsub.s32 0, %v1071_v21  ;;  %v408_v61 = vsub.s32 1, %v1071_v21  ;;  %p977_p1 = scmp.ne.s32.totalorder %s659_s2, %s976_s28  ;;  %p982_p3 = scmp.lt.s32.totalorder %s976_s28, %s976_s28 }
  0x2a   :  { %v881_v15 = vld [vmem:[#allocation5 + $0x50] sm:$0xff]   ;;  %v882_v16 = vld [vmem:[#allocation5 + $0x48] sm:$0xff]   ;;  %v883_v17 = vld [vmem:[#allocation5 + $0x40] sm:$0xff]  }
  0x2b   :  { %v884_v18 = vld [vmem:[#allocation5 + $0xb8] sm:$0xff]   ;;  %v885_v19 = vld [vmem:[#allocation5 + $0xb0] sm:$0xff]   ;;  %v169_v22 = vld [vmem:[#allocation7] sm:$0x1]  ;;  %p983_p4 = por %p982_p3, %p981_p2 }
  0x2c   :  { %762 = vmatpush3.bf16.msra.mxu0 %v868_v2  ;;  %782 = vmatpush3.bf16.msra.mxu1 %v877_v6  ;;  %v171_v23 = vpack.i.b16 %v169_v22, %v169_v22  ;;  %v886_v33 = vld [vmem:[#allocation5 + $0xa8] sm:$0xff]   ;;  %v887_v34 = vld [vmem:[#allocation5 + $0xa0] sm:$0xff]   ;;  %v888_v35 = vld [vmem:[#allocation5 + $0x98] sm:$0xff]   ;;  %v286_v41 = vshrl.u32 %v169_v22, 16 }
  0x2d   :  { %763 = vmatprep.subr.bf16.mxu0 %v1007_v0  ;;  %783 = vmatprep.subr.bf16.mxu1 %v1007_v0  ;;  %v889_v36 = vld [vmem:[#allocation5 + $0x90] sm:$0xff]   ;;  %v890_v37 = vld [vmem:[#allocation5 + $0x88] sm:$0xff]   ;;  %v891_v38 = vld [vmem:[#allocation5 + $0x80] sm:$0xff]   ;;  %p984_p5 = pnand %p983_p4, %p977_p1 }
  0x2e   :  { %v176_v27 = vrot.slane %v171_v23, %v175_v24  ;;  %v892_v39 = vld [vmem:[#allocation5 + $0xf8] sm:$0xff]   ;;  %v893_v40 = vld [vmem:[#allocation5 + $0xf0] sm:$0xff]   ;;  %v287_v42 = vpack.i.b16 %v286_v41, %v286_v41  ;;  %v894_v51 = vld [vmem:[#allocation5 + $0xe8] sm:$0xff]  }
  0x2f   :  { %v895_v52 = vld [vmem:[#allocation5 + $0xe0] sm:$0xff]   ;;  %v896_v53 = vld [vmem:[#allocation5 + $0xd8] sm:$0xff]   ;;  %v897_v54 = vld [vmem:[#allocation5 + $0xd0] sm:$0xff]  }
  0x30   :  { %764 = vmatpush3.bf16.msra.mxu0 %v869_v3  ;;  %784 = vmatpush3.bf16.msra.mxu1 %v878_v12  ;;  %v292_v45 = vrot.slane %v287_v42, %v175_v24  ;;  %v898_v55 = vld [vmem:[#allocation5 + $0xc8] sm:$0xff]   ;;  %v899_v56 = vld [vmem:[#allocation5 + $0xc0] sm:$0xff]   ;;  %v900_v57 = vld [vmem:[#allocation5 + $0x138] sm:$0xff]  }
  0x31   :  { %765 = vmatprep.subr.bf16.mxu0 %v1007_v0  ;;  %785 = vmatprep.subr.bf16.mxu1 %v1007_v0  ;;  %v901_v58 = vld [vmem:[#allocation5 + $0x130] sm:$0xff]   ;;  %v402_v59 = vld [vmem:[#allocation7] sm:$0x2]  ;;  %v635_v24 = vld [vmem:[#allocation7] sm:$0x4] }
  0x32   :  { %v404_v60 = vpack.i.b16 %v402_v59, %v402_v59  ;;  %v907_v12 = vld [vmem:[#allocation5 + $0x100] sm:$0xff]  }
  0x34   :  { %766 = vmatpush3.bf16.msra.mxu0 %v870_v4  ;;  %786 = vmatpush3.bf16.msra.mxu1 %v879_v13  ;;  %v409_v1 = vrot.slane %v404_v60, %v408_v61  ;;  %v519_v13 = vshrl.u32 %v402_v59, 16 }
  0x35   :  { %767 = vmatprep.subr.bf16.mxu0 %v1007_v0  ;;  %787 = vmatprep.subr.bf16.mxu1 %v1007_v0 }
  0x38   :  { %768 = vmatpush3.bf16.msra.mxu0 %v871_v7  ;;  %788 = vmatpush3.bf16.msra.mxu1 %v880_v14  ;;  %v902_v7 = vld [vmem:[#allocation5 + $0x128] sm:$0xff]   ;;  %v520_v14 = vpack.i.b16 %v519_v13, %v519_v13 }
  0x39   :  { %769 = vmatprep.subr.bf16.mxu0 %v1007_v0  ;;  %789 = vmatprep.subr.bf16.mxu1 %v1007_v0 }
  0x3c   :  { %770 = vmatpush3.bf16.msra.mxu0 %v872_v8  ;;  %790 = vmatpush3.bf16.msra.mxu1 %v881_v15  ;;  %v903_v8 = vld [vmem:[#allocation5 + $0x120] sm:$0xff]  }
  0x3d   :  { %771 = vmatprep.subr.bf16.mxu0 %v1007_v0  ;;  %791 = vmatprep.subr.bf16.mxu1 %v1007_v0 }
  0x40   :  { %772 = vmatpush3.bf16.msra.mxu0 %v873_v9  ;;  %792 = vmatpush3.bf16.msra.mxu1 %v882_v16  ;;  %v904_v9 = vld [vmem:[#allocation5 + $0x118] sm:$0xff]  }
  0x41   :  { %773 = vmatprep.subr.bf16.mxu0 %v1007_v0  ;;  %793 = vmatprep.subr.bf16.mxu1 %v1007_v0 }
  0x44   :  { %774 = vmatpush3.bf16.msra.mxu0 %v874_v10  ;;  %794 = vmatpush3.bf16.msra.mxu1 %v883_v17  ;;  %v905_v10 = vld [vmem:[#allocation5 + $0x110] sm:$0xff]   ;;  %v525_v17 = vrot.slane %v520_v14, %v408_v61 }
  0x45   :  { %799 = vmatprep.subr.bf16.mxu0 %v1007_v0  ;;  %819 = vmatprep.subr.bf16.mxu1 %v1007_v0 }
  0x47   :  { %776 = vmatmul.mubr.bf16.vlgmr.msra.gmra.mxu0 %v875_v11  ;;  %v906_v11 = vld [vmem:[#allocation5 + $0x108] sm:$0xff]  }
  0x48   :  { %815 = vmatprep.mubr.msk.bf16.mxu0 %vm1008_vm0, %v1007_v0  ;;  %800 = vmatpush3.bf16.msra.mxu0 %v884_v18 }
  0x49   :  { %801 = vmatprep.subr.bf16.mxu0 %v1007_v0 }
  0x4c   :  { %802 = vmatpush3.bf16.msra.mxu0 %v885_v19 }
  0x4d   :  { %803 = vmatprep.subr.bf16.mxu0 %v1007_v0 }
  0x50   :  { %804 = vmatpush3.bf16.msra.mxu0 %v886_v33 }
  0x51   :  { %805 = vmatprep.subr.bf16.mxu0 %v1007_v0 }
  0x54   :  { %806 = vmatpush3.bf16.msra.mxu0 %v887_v34 }
  0x55   :  { %807 = vmatprep.subr.bf16.mxu0 %v1007_v0 }
  0x58   :  { %808 = vmatpush3.bf16.msra.mxu0 %v888_v35 }
  0x59   :  { %809 = vmatprep.subr.bf16.mxu0 %v1007_v0 }
  0x5c   :  { %810 = vmatpush3.bf16.msra.mxu0 %v889_v36 }
  0x5d   :  { %811 = vmatprep.subr.bf16.mxu0 %v1007_v0 }
  0x60   :  { %812 = vmatpush3.bf16.msra.mxu0 %v890_v37 }
  0x61   :  { %813 = vmatprep.subr.bf16.mxu0 %v1007_v0 }
  0x64   :  { %814 = vmatpush3.bf16.msra.mxu0 %v891_v38 }
  0x65   :  { %839 = vmatprep.subr.bf16.mxu0 %v1007_v0 }
 0x107   :  { %v161_v25 = vpop.f32.mrf.mxu0 }
 0x109   :  { %v777_v26 = vpop.f32.mrf.mxu0 }
 0x10a   :  { %v641_v26 = vsub.s32 2, %v1071_v21 }
 0x10b   :  { %v164_v28 = vpop.f32.mrf.mxu0 }
 0x10c   :  { %v168_v29 = vpack.c.bf16 %v164_v28, %v161_v25  ;;  %v637_v25 = vpack.i.b16 %v635_v24, %v635_v24 }
 0x10d   :  { %v778_v30 = vpop.f32.mrf.mxu0 }
 0x10e   :  { %v177_v31 = vadd.bf16 %v176_v27, %v168_v29 }
 0x110   :  { %908 = vtanh.bf16 %v177_v31 }
 0x11e   :  { %v909_v32 = vpop.eup %908 }
 0x11f   :  { %796 = vmatmul.mubr.bf16.vlgmr.msra.gmra.mxu1 %v909_v32 }
 0x120   :  { %835 = vmatprep.mubr.msk.bf16.mxu1 %vm1008_vm0, %v1007_v0  ;;  %820 = vmatpush3.bf16.msra.mxu1 %v892_v39 }
 0x121   :  { %821 = vmatprep.subr.bf16.mxu1 %v1007_v0 }
 0x124   :  { %822 = vmatpush3.bf16.msra.mxu1 %v893_v40 }
 0x125   :  { %823 = vmatprep.subr.bf16.mxu1 %v1007_v0 }
 0x128   :  { %824 = vmatpush3.bf16.msra.mxu1 %v894_v51 }
 0x129   :  { %825 = vmatprep.subr.bf16.mxu1 %v1007_v0 }
 0x12c   :  { %826 = vmatpush3.bf16.msra.mxu1 %v895_v52 }
 0x12d   :  { %827 = vmatprep.subr.bf16.mxu1 %v1007_v0 }
 0x130   :  { %828 = vmatpush3.bf16.msra.mxu1 %v896_v53 }
 0x131   :  { %829 = vmatprep.subr.bf16.mxu1 %v1007_v0 }
 0x134   :  { %830 = vmatpush3.bf16.msra.mxu1 %v897_v54 }
 0x135   :  { %831 = vmatprep.subr.bf16.mxu1 %v1007_v0 }
 0x138   :  { %832 = vmatpush3.bf16.msra.mxu1 %v898_v55 }
 0x139   :  { %833 = vmatprep.subr.bf16.mxu1 %v1007_v0 }
 0x13c   :  { %834 = vmatpush3.bf16.msra.mxu1 %v899_v56 }
 0x1df   :  { %v278_v43 = vpop.f32.mrf.mxu1 }
 0x1e1   :  { %v797_v44 = vpop.f32.mrf.mxu1 }
 0x1e3   :  { %v281_v46 = vpop.f32.mrf.mxu1 }
 0x1e4   :  { %v285_v47 = vpack.c.bf16 %v281_v46, %v278_v43 }
 0x1e5   :  { %v798_v48 = vpop.f32.mrf.mxu1 }
 0x1e6   :  { %v293_v49 = vadd.bf16 %v292_v45, %v285_v47 }
 0x1e8   :  { %910 = vtanh.bf16 %v293_v49 }
 0x1f6   :  { %v911_v50 = vpop.eup %910 }
 0x1f7   :  { %816 = vmatmul.mubr.bf16.vlgmr.msra.gmra.mxu0 %v911_v50 }
 0x1f8   :  { %855 = vmatprep.mubr.msk.bf16.mxu0 %vm1008_vm0, %v1007_v0  ;;  %840 = vmatpush3.bf16.msra.mxu0 %v900_v57 }
 0x1f9   :  { %841 = vmatprep.subr.bf16.mxu0 %v1007_v0 }
 0x1fc   :  { %842 = vmatpush3.bf16.msra.mxu0 %v901_v58 }
 0x1fd   :  { %843 = vmatprep.subr.bf16.mxu0 %v1007_v0 }
 0x200   :  { %844 = vmatpush3.bf16.msra.mxu0 %v902_v7 }
 0x201   :  { %845 = vmatprep.subr.bf16.mxu0 %v1007_v0 }
 0x204   :  { %846 = vmatpush3.bf16.msra.mxu0 %v903_v8 }
 0x205   :  { %847 = vmatprep.subr.bf16.mxu0 %v1007_v0 }
 0x208   :  { %848 = vmatpush3.bf16.msra.mxu0 %v904_v9 }
 0x209   :  { %849 = vmatprep.subr.bf16.mxu0 %v1007_v0 }
 0x20c   :  { %850 = vmatpush3.bf16.msra.mxu0 %v905_v10 }
 0x20d   :  { %851 = vmatprep.subr.bf16.mxu0 %v1007_v0 }
 0x210   :  { %852 = vmatpush3.bf16.msra.mxu0 %v906_v11 }
 0x211   :  { %853 = vmatprep.subr.bf16.mxu0 %v1007_v0  ;;  %v642_v0 = vrot.slane %v637_v25, %v641_v26 }
 0x214   :  { %854 = vmatpush3.bf16.msra.mxu0 %v907_v12 }
 0x2b7   :  { %v394_v62 = vpop.f32.mrf.mxu0 }
 0x2b9   :  { %v817_v63 = vpop.f32.mrf.mxu0 }
 0x2bb   :  { %v397_v2 = vpop.f32.mrf.mxu0 }
 0x2bc   :  { %v401_v3 = vpack.c.bf16 %v397_v2, %v394_v62 }
 0x2bd   :  { %v818_v4 = vpop.f32.mrf.mxu0 }
 0x2be   :  { %v410_v5 = vadd.bf16 %v409_v1, %v401_v3 }
 0x2c0   :  { %912 = vtanh.bf16 %v410_v5 }
 0x2ce   :  { %v913_v6 = vpop.eup %912 }
 0x2cf   :  { %836 = vmatmul.mubr.bf16.vlgmr.msra.gmra.mxu1 %v913_v6 }
 0x38f   :  { %v511_v15 = vpop.f32.mrf.mxu1 }
 0x391   :  { %v837_v16 = vpop.f32.mrf.mxu1 }
 0x393   :  { %v514_v18 = vpop.f32.mrf.mxu1 }
 0x394   :  { %v518_v19 = vpack.c.bf16 %v514_v18, %v511_v15 }
 0x395   :  { %v838_v20 = vpop.f32.mrf.mxu1 }
 0x396   :  { %v526_v22 = vadd.bf16 %v525_v17, %v518_v19 }
 0x398   :  { %914 = vtanh.bf16 %v526_v22 }
 0x3a6   :  { %v915_v23 = vpop.eup %914 }
 0x3a7   :  { %856 = vmatmul.mubr.bf16.vlgmr.msra.gmra.mxu0 %v915_v23 }
 0x467   :  { %v627_v27 = vpop.f32.mrf.mxu0 }
 0x469   :  { %v857_v28 = vpop.f32.mrf.mxu0 }
 0x46b   :  { %v630_v29 = vpop.f32.mrf.mxu0 }
 0x46c   :  { %v634_v30 = vpack.c.bf16 %v630_v29, %v627_v27 }
 0x46d   :  { %v858_v31 = vpop.f32.mrf.mxu0 }
 0x46e   :  { %v643_v32 = vadd.bf16 %v642_v0, %v634_v30 }
 0x470   :  { %v712_v33 = vcombine.low %v643_v32, %v643_v32  ;;  %v713_v34 = vcombine.high %v643_v32, %v643_v32 }
 0x472   :  { %651 = vst [vmem:[#allocation8] sm:$0xf] %v712_v33  ;;  %652 = vst [vmem:[#allocation8 + $0x4] sm:$0xf] %v713_v34 }
 0x473   :  { %987 = shalt.err (!%p984_p5)
}
 0x474   :  { %664 = dma.vmem_to_hbm [thread:$0]  %s659_s2, 128, %s1109_s3, [#allocation4], %s1004_s17, %s1004_s17, %s1005_s18  }
 0x475   :  { %1000 = dma.done.wait [#allocation4], 128  }
 0x476   :  { %1001 = vsyncadd [#allocation4], 4294967168 }
 0x477   :  { %668 = vsyncpa [#allocation3], 1 }
 0x478   :  { %669 = vsyncpa [#allocation6], 1 }
 0x479   :  { %670 = vsyncpa [#allocation4], 1 }

</bundles_post_ra>
